<compile_context>
chip_gen: v6e
topology: v6e:2x2x1
jax: 0.10.0
libtpu: 0.0.40
codegen_flags: <defaults>
</compile_context>

<pallas_src>
import jax
import jax.numpy as jnp
from jax.experimental import pallas as pl
from jax.experimental.pallas import tpu as pltpu

N_FEAT = 1024        # number of independent MLPs (fixed by the module)
HID = 4              # hidden width of each tiny MLP
PARAM_ROWS = 24      # 4(w1x) + 4(w1z) + 4(b1) + 4(w2) + 1(b2) = 17, padded to 24 (mult of 8)
MAX_ROW_TILE = 512   # max batch rows per tile (3 blocks * 2 MiB * 2 bufs ~= 12 MiB VMEM, safe everywhere)
MEGACORE_MIN_B = 65  # above this, force >= 2 grid steps so v7x megacore gets both TCs


def _gen_independent_kernel(p_ref, x_ref, z_ref, o_ref):
    # p_ref : [PARAM_ROWS, F] packed per-feature params (hidden index on sublanes)
    #   rows [0:4)  = w1[:, k, 0]   (x weight)
    #   rows [4:8)  = w1[:, k, 1]   (z weight)
    #   rows [8:12) = b1[:, k]
    #   rows [12:16)= w2[:, 0, k]
    #   row  16     = b2[:, 0]
    # x_ref, z_ref, o_ref : [rows, F]
    x = x_ref[...]
    z = z_ref[...]

    acc = None
    for k in range(HID):
        pre = (p_ref[k:k + 1, :] * x
               + p_ref[HID + k:HID + k + 1, :] * z
               + p_ref[2 * HID + k:2 * HID + k + 1, :])
        h = jnp.maximum(pre, 0.0)
        term = p_ref[3 * HID + k:3 * HID + k + 1, :] * h
        acc = term if acc is None else acc + term
    # b2 added last via implicit [1, F] -> [rows, F] broadcast.
    o_ref[...] = (acc + p_ref[4 * HID:4 * HID + 1, :]).astype(o_ref.dtype)


def _pack_params(w1, b1, w2, b2, dtype):
    """Pack per-feature MLP params into a single [PARAM_ROWS, F] array (feature on lanes)."""
    F = w1.shape[0]
    w1x = jnp.transpose(w1[:, :, 0])          # [4, F]
    w1z = jnp.transpose(w1[:, :, 1])          # [4, F]
    b1t = jnp.transpose(b1)                   # [4, F]
    w2t = jnp.transpose(w2[:, 0, :])          # [4, F]
    b2t = jnp.transpose(b2)                   # [1, F]
    pad = jnp.zeros((PARAM_ROWS - (4 * HID + 1), F), w1.dtype)
    return jnp.concatenate([w1x, w1z, b1t, w2t, b2t, pad], axis=0).astype(dtype)


def _round_up(v, m):
    return ((v + m - 1) // m) * m


def _choose_tiling(B):
    """Pick (row_tile, n_tiles): ragged last block, >=2 steps for megacore when B is large."""
    if B < MEGACORE_MIN_B:
        return B, 1                                    # single full-extent block
    n_tiles = max(2, pl.cdiv(B, MAX_ROW_TILE))         # >= 2 steps (v7x megacore)
    row_tile = _round_up(pl.cdiv(B, n_tiles), 8)       # (8,128) rule for tiled axis
    return row_tile, pl.cdiv(B, row_tile)


def generator_independent(x, z, w1, b1, w2, b2):
    """Pallas forward of GeneratorIndependent.

    Args:
      x, z : [B, 1024]  float32 or bfloat16
      w1   : [1024, 4, 2]  first-layer weights of each MLP
      b1   : [1024, 4]
      w2   : [1024, 1, 4]  second-layer weights
      b2   : [1024, 1]
    Returns:
      [B, 1024] augmented features (same as the PyTorch module's output).
    """
    B, F = x.shape
    assert F == N_FEAT and z.shape == (B, F)

    params = _pack_params(w1, b1, w2, b2, x.dtype)     # [PARAM_ROWS, F]
    row_tile, n_tiles = _choose_tiling(B)

    itemsize = jnp.dtype(x.dtype).itemsize
    cost = pl.CostEstimate(
        flops=(7 * HID + 1) * B * F,                   # 29 flops per output element
        transcendentals=0,
        bytes_accessed=3 * B * F * itemsize + params.size * params.dtype.itemsize,
    )

    return pl.pallas_call(
        _gen_independent_kernel,
        out_shape=jax.ShapeDtypeStruct((B, F), x.dtype),
        grid_spec=pltpu.PrefetchScalarGridSpec(
            num_scalar_prefetch=0,
            grid=(n_tiles,),
            in_specs=[
                # params: constant block index -> fetched once, stays resident
                pl.BlockSpec((PARAM_ROWS, F), lambda b: (0, 0)),
                pl.BlockSpec((row_tile, F), lambda b: (b, 0)),   # x
                pl.BlockSpec((row_tile, F), lambda b: (b, 0)),   # z
            ],
            out_specs=pl.BlockSpec((row_tile, F), lambda b: (b, 0)),
        ),
        compiler_params=pltpu.CompilerParams(
            dimension_semantics=("parallel",)),
        cost_estimate=cost,
    )(params, x, z)


def _reference(x, z, w1, b1, w2, b2):
    # Pure-JAX reference mirroring the PyTorch loop (vectorised over features).
    data = jnp.stack([x, z], axis=2)                       # [B, F, 2]
    h = jnp.einsum('bfi,fki->bfk', data, w1) + b1[None]    # [B, F, 4]
    h = jnp.maximum(h, 0.0)
    o = jnp.einsum('bfk,fok->bfo', h, w2) + b2[None]       # [B, F, 1]
    return o[..., 0]                                       # [B, F]


if __name__ == "__main__":
    key = jax.random.PRNGKey(0)
    kx, kz, kw1, kb1, kw2, kb2 = jax.random.split(key, 6)

    # Deterministic synthetic params (PyTorch-Linear-like uniform ranges).
    lim1 = 1.0 / (2.0 ** 0.5)   # fan_in = 2
    lim2 = 1.0 / (4.0 ** 0.5)   # fan_in = 4
    w1 = jax.random.uniform(kw1, (N_FEAT, HID, 2), jnp.float32, -lim1, lim1)
    b1 = jax.random.uniform(kb1, (N_FEAT, HID), jnp.float32, -lim1, lim1)
    w2 = jax.random.uniform(kw2, (N_FEAT, 1, HID), jnp.float32, -lim2, lim2)
    b2 = jax.random.uniform(kb2, (N_FEAT, 1), jnp.float32, -lim2, lim2)

    # Small-batch path (single full-extent block, grid=(1,)).
    B = 2
    x = jax.random.normal(kx, (B, N_FEAT), jnp.float32)
    z = jax.random.normal(kz, (B, N_FEAT), jnp.float32)
    out = jax.block_until_ready(generator_independent(x, z, w1, b1, w2, b2))
    ref = _reference(x, z, w1, b1, w2, b2)
    assert out.shape == (B, N_FEAT)
    assert jnp.allclose(out, ref, atol=1e-5, rtol=1e-5), "mismatch vs reference (B=2)"

    # Megacore-split + ragged-last-block path (B > 64, not a multiple of the tile).
    B2 = 84
    kx2, kz2 = jax.random.split(kx)
    x2 = jax.random.normal(kx2, (B2, N_FEAT), jnp.float32)
    z2 = jax.random.normal(kz2, (B2, N_FEAT), jnp.float32)
    out2 = jax.block_until_ready(generator_independent(x2, z2, w1, b1, w2, b2))
    ref2 = _reference(x2, z2, w1, b1, w2, b2)
    assert out2.shape == (B2, N_FEAT)
    assert jnp.allclose(out2, ref2, atol=1e-5, rtol=1e-5), "mismatch vs reference (B=84)"

    print("KERNEL_OK")
</pallas_src>

<mosaic_0001>
module attributes {stable_mosaic.version = 11 : i64} {
  func.func @_gen_independent_kernel(%arg0: i32, %arg1: memref<24x1024xf32, #tpu.memory_space<vmem>>, %arg2: memref<2x1024xf32, #tpu.memory_space<vmem>>, %arg3: memref<2x1024xf32, #tpu.memory_space<vmem>>, %arg4: memref<2x1024xf32, #tpu.memory_space<vmem>>) attributes {dimension_semantics = [#tpu.dimension_semantics<parallel>], iteration_bounds = array<i64: 1>, scalar_prefetch = 0 : i64, scratch_operands = 0 : i64, tpu.core_type = #tpu.core_type<tc>, window_params = [{pipeline_mode = #tpu.pipeline_mode<synchronous>, transform_indices = @transform_0, window_bounds = array<i64: 24, 1024>}, {transform_indices = @transform_1, window_bounds = array<i64: 2, 1024>}, {transform_indices = @transform_2, window_bounds = array<i64: 2, 1024>}, {transform_indices = @transform_3, window_bounds = array<i64: 2, 1024>}]} {
    %c0 = arith.constant 0 : index
    %c0_0 = arith.constant 0 : index
    %0 = vector.load %arg2[%c0, %c0_0] : memref<2x1024xf32, #tpu.memory_space<vmem>>, vector<2x1024xf32>
    %c0_1 = arith.constant 0 : index
    %c0_2 = arith.constant 0 : index
    %1 = vector.load %arg3[%c0_1, %c0_2] : memref<2x1024xf32, #tpu.memory_space<vmem>>, vector<2x1024xf32>
    %c0_3 = arith.constant 0 : index
    %c0_4 = arith.constant 0 : index
    %2 = vector.load %arg1[%c0_3, %c0_4] : memref<24x1024xf32, #tpu.memory_space<vmem>>, vector<1x1024xf32>
    %3 = vector.broadcast %2 : vector<1x1024xf32> to vector<2x1024xf32>
    %4 = arith.mulf %3, %0 : vector<2x1024xf32>
    %c4 = arith.constant 4 : index
    %c0_5 = arith.constant 0 : index
    %5 = vector.load %arg1[%c4, %c0_5] : memref<24x1024xf32, #tpu.memory_space<vmem>>, vector<1x1024xf32>
    %6 = vector.broadcast %5 : vector<1x1024xf32> to vector<2x1024xf32>
    %7 = arith.mulf %6, %1 : vector<2x1024xf32>
    %8 = arith.addf %4, %7 : vector<2x1024xf32>
    %c8 = arith.constant 8 : index
    %c0_6 = arith.constant 0 : index
    %9 = vector.load %arg1[%c8, %c0_6] : memref<24x1024xf32, #tpu.memory_space<vmem>>, vector<1x1024xf32>
    %10 = vector.broadcast %9 : vector<1x1024xf32> to vector<2x1024xf32>
    %11 = arith.addf %8, %10 : vector<2x1024xf32>
    %cst = arith.constant 0.000000e+00 : f32
    %12 = vector.broadcast %cst : f32 to vector<2x1024xf32>
    %13 = arith.maximumf %11, %12 : vector<2x1024xf32>
    %c12 = arith.constant 12 : index
    %c0_7 = arith.constant 0 : index
    %14 = vector.load %arg1[%c12, %c0_7] : memref<24x1024xf32, #tpu.memory_space<vmem>>, vector<1x1024xf32>
    %15 = vector.broadcast %14 : vector<1x1024xf32> to vector<2x1024xf32>
    %16 = arith.mulf %15, %13 : vector<2x1024xf32>
    %c1 = arith.constant 1 : index
    %c0_8 = arith.constant 0 : index
    %17 = vector.load %arg1[%c1, %c0_8] : memref<24x1024xf32, #tpu.memory_space<vmem>>, vector<1x1024xf32>
    %18 = vector.broadcast %17 : vector<1x1024xf32> to vector<2x1024xf32>
    %19 = arith.mulf %18, %0 : vector<2x1024xf32>
    %c5 = arith.constant 5 : index
    %c0_9 = arith.constant 0 : index
    %20 = vector.load %arg1[%c5, %c0_9] : memref<24x1024xf32, #tpu.memory_space<vmem>>, vector<1x1024xf32>
    %21 = vector.broadcast %20 : vector<1x1024xf32> to vector<2x1024xf32>
    %22 = arith.mulf %21, %1 : vector<2x1024xf32>
    %23 = arith.addf %19, %22 : vector<2x1024xf32>
    %c9 = arith.constant 9 : index
    %c0_10 = arith.constant 0 : index
    %24 = vector.load %arg1[%c9, %c0_10] : memref<24x1024xf32, #tpu.memory_space<vmem>>, vector<1x1024xf32>
    %25 = vector.broadcast %24 : vector<1x1024xf32> to vector<2x1024xf32>
    %26 = arith.addf %23, %25 : vector<2x1024xf32>
    %cst_11 = arith.constant 0.000000e+00 : f32
    %27 = vector.broadcast %cst_11 : f32 to vector<2x1024xf32>
    %28 = arith.maximumf %26, %27 : vector<2x1024xf32>
    %c13 = arith.constant 13 : index
    %c0_12 = arith.constant 0 : index
    %29 = vector.load %arg1[%c13, %c0_12] : memref<24x1024xf32, #tpu.memory_space<vmem>>, vector<1x1024xf32>
    %30 = vector.broadcast %29 : vector<1x1024xf32> to vector<2x1024xf32>
    %31 = arith.mulf %30, %28 : vector<2x1024xf32>
    %32 = arith.addf %16, %31 : vector<2x1024xf32>
    %c2 = arith.constant 2 : index
    %c0_13 = arith.constant 0 : index
    %33 = vector.load %arg1[%c2, %c0_13] : memref<24x1024xf32, #tpu.memory_space<vmem>>, vector<1x1024xf32>
    %34 = vector.broadcast %33 : vector<1x1024xf32> to vector<2x1024xf32>
    %35 = arith.mulf %34, %0 : vector<2x1024xf32>
    %c6 = arith.constant 6 : index
    %c0_14 = arith.constant 0 : index
    %36 = vector.load %arg1[%c6, %c0_14] : memref<24x1024xf32, #tpu.memory_space<vmem>>, vector<1x1024xf32>
    %37 = vector.broadcast %36 : vector<1x1024xf32> to vector<2x1024xf32>
    %38 = arith.mulf %37, %1 : vector<2x1024xf32>
    %39 = arith.addf %35, %38 : vector<2x1024xf32>
    %c10 = arith.constant 10 : index
    %c0_15 = arith.constant 0 : index
    %40 = vector.load %arg1[%c10, %c0_15] : memref<24x1024xf32, #tpu.memory_space<vmem>>, vector<1x1024xf32>
    %41 = vector.broadcast %40 : vector<1x1024xf32> to vector<2x1024xf32>
    %42 = arith.addf %39, %41 : vector<2x1024xf32>
    %cst_16 = arith.constant 0.000000e+00 : f32
    %43 = vector.broadcast %cst_16 : f32 to vector<2x1024xf32>
    %44 = arith.maximumf %42, %43 : vector<2x1024xf32>
    %c14 = arith.constant 14 : index
    %c0_17 = arith.constant 0 : index
    %45 = vector.load %arg1[%c14, %c0_17] : memref<24x1024xf32, #tpu.memory_space<vmem>>, vector<1x1024xf32>
    %46 = vector.broadcast %45 : vector<1x1024xf32> to vector<2x1024xf32>
    %47 = arith.mulf %46, %44 : vector<2x1024xf32>
    %48 = arith.addf %32, %47 : vector<2x1024xf32>
    %c3 = arith.constant 3 : index
    %c0_18 = arith.constant 0 : index
    %49 = vector.load %arg1[%c3, %c0_18] : memref<24x1024xf32, #tpu.memory_space<vmem>>, vector<1x1024xf32>
    %50 = vector.broadcast %49 : vector<1x1024xf32> to vector<2x1024xf32>
    %51 = arith.mulf %50, %0 : vector<2x1024xf32>
    %c7 = arith.constant 7 : index
    %c0_19 = arith.constant 0 : index
    %52 = vector.load %arg1[%c7, %c0_19] : memref<24x1024xf32, #tpu.memory_space<vmem>>, vector<1x1024xf32>
    %53 = vector.broadcast %52 : vector<1x1024xf32> to vector<2x1024xf32>
    %54 = arith.mulf %53, %1 : vector<2x1024xf32>
    %55 = arith.addf %51, %54 : vector<2x1024xf32>
    %c11 = arith.constant 11 : index
    %c0_20 = arith.constant 0 : index
    %56 = vector.load %arg1[%c11, %c0_20] : memref<24x1024xf32, #tpu.memory_space<vmem>>, vector<1x1024xf32>
    %57 = vector.broadcast %56 : vector<1x1024xf32> to vector<2x1024xf32>
    %58 = arith.addf %55, %57 : vector<2x1024xf32>
    %cst_21 = arith.constant 0.000000e+00 : f32
    %59 = vector.broadcast %cst_21 : f32 to vector<2x1024xf32>
    %60 = arith.maximumf %58, %59 : vector<2x1024xf32>
    %c15 = arith.constant 15 : index
    %c0_22 = arith.constant 0 : index
    %61 = vector.load %arg1[%c15, %c0_22] : memref<24x1024xf32, #tpu.memory_space<vmem>>, vector<1x1024xf32>
    %62 = vector.broadcast %61 : vector<1x1024xf32> to vector<2x1024xf32>
    %63 = arith.mulf %62, %60 : vector<2x1024xf32>
    %64 = arith.addf %48, %63 : vector<2x1024xf32>
    %c16 = arith.constant 16 : index
    %c0_23 = arith.constant 0 : index
    %65 = vector.load %arg1[%c16, %c0_23] : memref<24x1024xf32, #tpu.memory_space<vmem>>, vector<1x1024xf32>
    %66 = vector.broadcast %65 : vector<1x1024xf32> to vector<2x1024xf32>
    %67 = arith.addf %64, %66 : vector<2x1024xf32>
    %c0_24 = arith.constant 0 : index
    %c0_25 = arith.constant 0 : index
    %68 = vector.load %arg4[%c0_24, %c0_25] : memref<2x1024xf32, #tpu.memory_space<vmem>>, vector<2x1024xf32>
    tpu.vector_store %arg4[%c0_24, %c0_25], %67 {strides = array<i32>} : memref<2x1024xf32, #tpu.memory_space<vmem>>, vector<2x1024xf32>,
    return
  }
  func.func @transform_0(%arg0: i32) -> (i32, i32) {
    %c0_i32 = arith.constant 0 : i32
    %c0_i32_0 = arith.constant 0 : i32
    %c0_i32_1 = arith.constant 0 : i32
    return %c0_i32, %c0_i32_0 : i32, i32
  }
  func.func @transform_1(%arg0: i32) -> (i32, i32) {
    %c0_i32 = arith.constant 0 : i32
    %c0_i32_0 = arith.constant 0 : i32
    return %arg0, %c0_i32 : i32, i32
  }
  func.func @transform_2(%arg0: i32) -> (i32, i32) {
    %c0_i32 = arith.constant 0 : i32
    %c0_i32_0 = arith.constant 0 : i32
    return %arg0, %c0_i32 : i32, i32
  }
  func.func @transform_3(%arg0: i32) -> (i32, i32) {
    %c0_i32 = arith.constant 0 : i32
    %c0_i32_0 = arith.constant 0 : i32
    return %arg0, %c0_i32 : i32, i32
  }
}

</mosaic_0001>

<bundles_post_ra>
// kernel: tpu_custom_call.1
= control target key start
LH: loop header
LB: loop body
LE: loop exit
PB: predicated region body
PF: predicated region fallthrough
CT: control target
= control target key end

     0   :  { %8 = vsyncpa [#allocation3], 0  ;;  %s1760_s0 = inlined_call_operand.hbm [shape: f32[24,1024], index: 0, kind: input, shape index: {}]   ;;  %s1761_s1 = inlined_call_operand.hbm [shape: f32[2,1024], index: 1, kind: input, shape index: {}]   ;;  %s1762_s2 = inlined_call_operand.hbm [shape: f32[2,1024], index: 2, kind: input, shape index: {}]   ;;  %s1763_s3 = inlined_call_operand.hbm [shape: f32[2,1024], index: 3, kind: output, shape index: {}]  }
   0x1   :  { %9 = vsyncpa [#allocation6], 0 }
   0x2   :  { %10 = vsyncpa [#allocation4], 0  ;;  %s1291_s12 = smov [#allocation5]   ;;  %s1292_s14 = smov [#allocation2]  }
   0x3   :  { %s29_s13 = sshll.u32 %s1291_s12, 4  ;;  %s16_s15 = sshll.u32 %s1292_s14, 4  ;;  %s30_s13 = int_to_ptr.vmem [resolvable:$true] %s29_s13  ;;  %s17_s15 = int_to_ptr.vmem [resolvable:$true] %s16_s15 }
   0x4   :  { %s1213_s16 = scalar_lea.vmem %s30_s13, 256  ;;  %p1218_p1 = scmp.lt.s32.totalorder %s30_s13, %s30_s13 }
   0x5   :  { %p1214_p0 = scmp.ne.s32.totalorder %s30_s13, %s1213_s16  ;;  %p1219_p2 = scmp.lt.s32.totalorder %s1213_s16, %s1213_s16 }
   0x7   :  { %p1220_p3 = por %p1219_p2, %p1218_p1 }
   0x9   :  { %p1221_p4 = pnand %p1220_p3, %p1214_p0 }
   0xb   :  { %1224 = shalt.err (!%p1221_p4)
}
   0xc   :  { %32 = dma.hbm_to_vmem [thread:$0]  %s1761_s1, 256, %s30_s13, [#allocation6]  }
   0xd   :  { %s1233_s19 = scalar_lea.vmem %s17_s15, 3072  ;;  %p1238_p6 = scmp.lt.s32.totalorder %s17_s15, %s17_s15 }
   0xe   :  { %p1234_p5 = scmp.ne.s32.totalorder %s17_s15, %s1233_s19  ;;  %p1239_p7 = scmp.lt.s32.totalorder %s1233_s19, %s1233_s19 }
  0x10   :  { %p1240_p8 = por %p1239_p7, %p1238_p6 }
  0x12   :  { %p1241_p9 = pnand %p1240_p8, %p1234_p5 }
  0x14   :  { %1244 = shalt.err (!%p1241_p9)
}
  0x15   :  { %s1293_s20 = smov 1024   ;;  %s1294_s21 = smov 64  }
  0x16   :  { %22 = dma.hbm_to_vmem [thread:$0]  %s1760_s0, 3072, %s17_s15, [#allocation3], %s1293_s20, %s1293_s20, %s1294_s21  }
  0x17   :  { %s1295_s24 = smov [#allocation7]  }
  0x18   :  { %s39_s25 = sshll.u32 %s1295_s24, 4  ;;  %s40_s25 = int_to_ptr.vmem [resolvable:$true] %s39_s25 }
  0x19   :  { %s1253_s26 = scalar_lea.vmem %s40_s25, 256  ;;  %p1258_p11 = scmp.lt.s32.totalorder %s40_s25, %s40_s25 }
  0x1a   :  { %p1254_p10 = scmp.ne.s32.totalorder %s40_s25, %s1253_s26  ;;  %p1259_p12 = scmp.lt.s32.totalorder %s1253_s26, %s1253_s26 }
  0x1c   :  { %p1260_p13 = por %p1259_p12, %p1258_p11 }
  0x1e   :  { %p1261_p0 = pnand %p1260_p13, %p1254_p10 }
  0x20   :  { %1264 = shalt.err (!%p1261_p0)
}
  0x21   :  { %42 = dma.hbm_to_vmem [thread:$0]  %s1762_s2, 256, %s40_s25, [#allocation6]  }
  0x22   :  { %1285 = dma.done.wait [#allocation3], 3072  }
  0x23   :  { %1286 = vsyncadd [#allocation3], 4294964224 }
  0x24   :  { %1287 = dma.done.wait [#allocation6], 512  }
  0x25   :  { %1288 = vsyncadd [#allocation6], 4294966784  ;;  %v60_v0 = vlaneseq  ;;  %v1296_v1 = vmov 1983009808   ;;  %v52_v11 = vld [vmem:[#allocation5] sm:$0xff]  ;;  %v53_v12 = vld [vmem:[#allocation5 + $0x8] sm:$0xff] }
  0x26   :  { %v104_v2 = vunpack.c.l.s4 %v1296_v1  ;;  %v54_v13 = vld [vmem:[#allocation7] sm:$0xff]  ;;  %v55_v17 = vld [vmem:[#allocation7 + $0x8] sm:$0xff]  ;;  %v102_v19 = vcombine.high %v52_v11, %v52_v11  ;;  %v119_v21 = vcombine.high %v53_v12, %v53_v12  ;;  %s1297_s0 = smov [#allocation8]  }
  0x27   :  { %v61_v3 = vshrl.u32 %v60_v0, 7  ;;  %v56_v18 = vld [vmem:[#allocation2] ss:$8 sm:$0xf]  ;;  %v199_v25 = vcombine.high %v54_v13, %v54_v13  ;;  %v216_v27 = vcombine.high %v55_v17, %v55_v17  ;;  %s1184_s2 = sshll.u32 %s1297_s0, 4  ;;  %s1185_s2 = int_to_ptr.vmem [resolvable:$true] %s1184_s2 }
  0x28   :  { %v105_v4 = vunpack.c.0.s8 %v104_v2  ;;  %v57_v23 = vld [vmem:[#allocation2] ss:$8 sm:$0xf0]  ;;  %v153_v24 = vld [vmem:[#allocation2 + $0x4] ss:$8 sm:$0xf]  ;;  %p1270_p2 = scmp.lt.s32.totalorder %s1185_s2, %s1185_s2 }
  0x29   :  { %v1327_v5 = vsub.s32 0, %v61_v3  ;;  %v1329_v6 = vsub.s32 1, %v61_v3  ;;  %v1331_v7 = vsub.s32 2, %v61_v3  ;;  %v1333_v8 = vsub.s32 3, %v61_v3  ;;  %s1265_s28 = scalar_lea.vmem %s1185_s2, 256 }
  0x2a   :  { %v1335_v9 = vsub.s32 4, %v61_v3  ;;  %v1337_v10 = vsub.s32 %v105_v4, %v61_v3  ;;  %v1339_v14 = vsub.s32 5, %v61_v3  ;;  %v1341_v15 = vsub.s32 6, %v61_v3  ;;  %v154_v33 = vld [vmem:[#allocation2 + $0x4] ss:$8 sm:$0xf0]  ;;  %p1266_p1 = scmp.ne.s32.totalorder %s1185_s2, %s1265_s28  ;;  %p1271_p3 = scmp.lt.s32.totalorder %s1265_s28, %s1265_s28 }
  0x2b   :  { %v1343_v16 = vsub.s32 7, %v61_v3  ;;  %v58_v29 = vor.u32 %v57_v23, %v56_v18  ;;  %v155_v35 = vor.u32 %v154_v33, %v153_v24  ;;  %v258_v2 = vld [vmem:[#allocation2 + $0x40] ss:$8 sm:$0xf] }
  0x2c   :  { %1785 = vst [vmem:[#allocation12_spill] sm:$0xff] %v1337_v10  ;;  %v1346_v20 = vrot.slane %v52_v11, %v1337_v10  ;;  %v1349_v22 = vrot.slane %v53_v12, %v1337_v10  ;;  %v1352_v26 = vrot.slane %v54_v13, %v1337_v10  ;;  %v1355_v28 = vrot.slane %v55_v17, %v1337_v10  ;;  %v259_v3 = vld [vmem:[#allocation2 + $0x40] ss:$8 sm:$0xf0]  ;;  %p1272_p4 = por %p1271_p3, %p1270_p2 }
  0x2d   :  { %v1358_v30 = vrot.slane %v102_v19, %v1337_v10  ;;  %v1365_v32 = vrot.slane %v119_v21, %v1337_v10  ;;  %v1372_v36 = vrot.slane %v199_v25, %v1337_v10  ;;  %v63_v38 = vrot.slane %v58_v29, %v1327_v5  ;;  %v319_v4 = vld [vmem:[#allocation2 + $0x44] ss:$8 sm:$0xf]  ;;  %v372_v12 = vld [vmem:[#allocation2 + $0x1] ss:$8 sm:$0xf] }
  0x2e   :  { %1786 = vst [vmem:[#allocation13_spill] sm:$0xff] %v1352_v26  ;;  %1787 = vst [vmem:[#allocation14_spill] sm:$0xff] %v1355_v28  ;;  %v1362_v31 = vcombine.high %v1346_v20, %v1346_v20  ;;  %v1369_v34 = vcombine.high %v1349_v22, %v1349_v22  ;;  %v1376_v37 = vcombine.high %v1352_v26, %v1352_v26  ;;  %v320_v11 = vld [vmem:[#allocation2 + $0x44] ss:$8 sm:$0xf0]  ;;  %p1273_p5 = pnand %p1272_p4, %p1266_p1 }
  0x2f   :  { %1788 = vst [vmem:[#allocation15_spill] sm:$0xff] %v1372_v36  ;;  %v67_v39 = vrot.slane %v58_v29, %v1329_v6  ;;  %v71_v40 = vrot.slane %v58_v29, %v1331_v7  ;;  %v75_v41 = vrot.slane %v58_v29, %v1333_v8  ;;  %v79_v42 = vrot.slane %v58_v29, %v1335_v9  ;;  %v373_v13 = vld [vmem:[#allocation2 + $0x1] ss:$8 sm:$0xf0] }
  0x30   :  { %1789 = vst [vmem:[#allocation16_spill] sm:$0xff] %v1376_v37  ;;  %v83_v43 = vrot.slane %v58_v29, %v1339_v14  ;;  %v87_v44 = vrot.slane %v58_v29, %v1341_v15  ;;  %v91_v45 = vrot.slane %v58_v29, %v1343_v16  ;;  %v1388_v46 = vcombine.high %v1358_v30, %v1358_v30  ;;  %v425_v23 = vld [vmem:[#allocation2 + $0x5] ss:$8 sm:$0xf] }
  0x31   :  { %v1392_v47 = vcombine.high %v1365_v32, %v1365_v32  ;;  %v144_v48 = vmul.f32 %v1346_v20, %v63_v38  ;;  %v145_v49 = vmul.f32 %v1362_v31, %v67_v39  ;;  %v146_v50 = vmul.f32 %v1358_v30, %v71_v40  ;;  %v426_v24 = vld [vmem:[#allocation2 + $0x5] ss:$8 sm:$0xf0]  ;;  %v487_v38 = vld [vmem:[#allocation2 + $0x41] ss:$8 sm:$0xf0] }
  0x32   :  { %v148_v51 = vmul.f32 %v1349_v22, %v79_v42  ;;  %v149_v52 = vmul.f32 %v1369_v34, %v83_v43  ;;  %v150_v53 = vmul.f32 %v1365_v32, %v87_v44  ;;  %v147_v54 = vmul.f32 %v1388_v46, %v75_v41  ;;  %v547_v43 = vld [vmem:[#allocation2 + $0x45] ss:$8 sm:$0xf] }
  0x33   :  { %v151_v55 = vmul.f32 %v1392_v47, %v91_v45  ;;  %v160_v56 = vrot.slane %v155_v35, %v1327_v5  ;;  %v164_v57 = vrot.slane %v155_v35, %v1329_v6  ;;  %v168_v58 = vrot.slane %v155_v35, %v1331_v7  ;;  %v548_v44 = vld [vmem:[#allocation2 + $0x45] ss:$8 sm:$0xf0] }
  0x34   :  { %v172_v59 = vrot.slane %v155_v35, %v1333_v8  ;;  %v176_v60 = vrot.slane %v155_v35, %v1335_v9  ;;  %v180_v61 = vrot.slane %v155_v35, %v1339_v14  ;;  %v184_v62 = vrot.slane %v155_v35, %v1341_v15 }
  0x35   :  { %v188_v63 = vrot.slane %v155_v35, %v1343_v16  ;;  %v1412_v0 = vcombine.high %v1372_v36, %v1372_v36  ;;  %v1415_v1 = vrot.slane %v216_v27, %v1337_v10  ;;  %v1419_v17 = vcombine.high %v1355_v28, %v1355_v28  ;;  %v486_v35 = vld [vmem:[#allocation2 + $0x41] ss:$8 sm:$0xf] }
  0x36   :  { %v241_v18 = vmul.f32 %v1352_v26, %v160_v56  ;;  %v242_v19 = vmul.f32 %v1376_v37, %v164_v57  ;;  %v243_v21 = vmul.f32 %v1372_v36, %v168_v58  ;;  %v245_v29 = vmul.f32 %v1355_v28, %v176_v60 }
  0x37   :  { %1790 = vst [vmem:[#allocation17_spill] sm:$0xff] %v1412_v0  ;;  %1791 = vst [vmem:[#allocation18_spill] sm:$0xff] %v1415_v1  ;;  %v1426_v25 = vcombine.high %v1415_v1, %v1415_v1  ;;  %v244_v27 = vmul.f32 %v1412_v0, %v172_v59  ;;  %v247_v33 = vmul.f32 %v1415_v1, %v184_v62 }
  0x38   :  { %1792 = vst [vmem:[#allocation19_spill] sm:$0xff] %v1419_v17  ;;  %v246_v39 = vmul.f32 %v1419_v17, %v180_v61  ;;  %v249_v40 = vadd.f32 %v241_v18, %v144_v48  ;;  %v250_v41 = vadd.f32 %v242_v19, %v145_v49  ;;  %v251_v42 = vadd.f32 %v243_v21, %v146_v50 }
  0x39   :  { %1793 = vst [vmem:[#allocation20_spill] sm:$0xff] %v1426_v25  ;;  %v248_v45 = vmul.f32 %v1426_v25, %v188_v63  ;;  %v252_v56 = vadd.f32 %v244_v27, %v147_v54  ;;  %v253_v57 = vadd.f32 %v245_v29, %v148_v51  ;;  %v255_v58 = vadd.f32 %v247_v33, %v150_v53 }
  0x3a   :  { %v254_v10 = vadd.f32 %v246_v39, %v149_v52  ;;  %v260_v59 = vor.u32 %v259_v3, %v258_v2  ;;  %v321_v0 = vor.u32 %v320_v11, %v319_v4  ;;  %v374_v60 = vor.u32 %v373_v13, %v372_v12 }
  0x3b   :  { %v256_v28 = vadd.f32 %v248_v45, %v151_v55  ;;  %v1433_v62 = vor.u32 %v426_v24, %v425_v23  ;;  %v1435_v1 = vor.u32 %v487_v38, %v486_v35  ;;  %v1437_v61 = vor.u32 %v548_v44, %v547_v43 }
  0x3c   :  { %v265_v48 = vrot.slane %v260_v59, %v1327_v5  ;;  %v269_v49 = vrot.slane %v260_v59, %v1329_v6  ;;  %v273_v50 = vrot.slane %v260_v59, %v1331_v7  ;;  %v277_v51 = vrot.slane %v260_v59, %v1333_v8 }
  0x3d   :  { %v281_v52 = vrot.slane %v260_v59, %v1335_v9  ;;  %v285_v53 = vrot.slane %v260_v59, %v1339_v14  ;;  %v289_v54 = vrot.slane %v260_v59, %v1341_v15  ;;  %v293_v55 = vrot.slane %v260_v59, %v1343_v16 }
  0x3e   :  { %v302_v63 = vadd.f32 %v265_v48, %v249_v40  ;;  %v303_v2 = vadd.f32 %v269_v49, %v250_v41  ;;  %v304_v3 = vadd.f32 %v273_v50, %v251_v42  ;;  %v305_v4 = vadd.f32 %v277_v51, %v252_v56 }
  0x3f   :  { %v306_v11 = vadd.f32 %v281_v52, %v253_v57  ;;  %v307_v12 = vadd.f32 %v285_v53, %v254_v10  ;;  %v308_v13 = vadd.f32 %v289_v54, %v255_v58  ;;  %v309_v18 = vadd.f32 %v293_v55, %v256_v28 }
  0x40   :  { %v310_v19 = vmax.f32 %v302_v63, 0.0  ;;  %v311_v21 = vmax.f32 %v303_v2, 0.0  ;;  %v312_v23 = vmax.f32 %v304_v3, 0.0  ;;  %v313_v24 = vmax.f32 %v305_v4, 0.0 }
  0x41   :  { %v314_v27 = vmax.f32 %v306_v11, 0.0  ;;  %v315_v29 = vmax.f32 %v307_v12, 0.0  ;;  %v316_v33 = vmax.f32 %v308_v13, 0.0  ;;  %v317_v35 = vmax.f32 %v309_v18, 0.0 }
  0x42   :  { %v326_v38 = vrot.slane %v321_v0, %v1327_v5  ;;  %v330_v39 = vrot.slane %v321_v0, %v1329_v6  ;;  %v334_v40 = vrot.slane %v321_v0, %v1331_v7  ;;  %v338_v41 = vrot.slane %v321_v0, %v1333_v8 }
  0x43   :  { %v342_v10 = vrot.slane %v321_v0, %v1335_v9  ;;  %v346_v28 = vrot.slane %v321_v0, %v1339_v14  ;;  %v350_v42 = vrot.slane %v321_v0, %v1341_v15  ;;  %v354_v43 = vrot.slane %v321_v0, %v1343_v16 }
  0x44   :  { %v1455_v44 = vmul.f32 %v326_v38, %v310_v19  ;;  %v1457_v45 = vmul.f32 %v330_v39, %v311_v21  ;;  %v1459_v56 = vmul.f32 %v334_v40, %v312_v23  ;;  %v1461_v57 = vmul.f32 %v338_v41, %v313_v24  ;;  %v1794_v41 = vld [vmem:[#allocation17_spill] sm:$0xff] }
  0x45   :  { %v1463_v58 = vmul.f32 %v342_v10, %v314_v27  ;;  %v1465_v59 = vmul.f32 %v346_v28, %v315_v29  ;;  %v1467_v48 = vmul.f32 %v350_v42, %v316_v33  ;;  %v1469_v49 = vmul.f32 %v354_v43, %v317_v35  ;;  %v1795_v28 = vld [vmem:[#allocation14_spill] sm:$0xff] }
  0x46   :  { %v379_v50 = vrot.slane %v374_v60, %v1327_v5  ;;  %v383_v0 = vrot.slane %v374_v60, %v1329_v6  ;;  %v387_v51 = vrot.slane %v374_v60, %v1331_v7  ;;  %v391_v52 = vrot.slane %v374_v60, %v1333_v8 }
  0x47   :  { %v395_v53 = vrot.slane %v374_v60, %v1335_v9  ;;  %v399_v54 = vrot.slane %v374_v60, %v1339_v14  ;;  %v403_v55 = vrot.slane %v374_v60, %v1341_v15  ;;  %v407_v63 = vrot.slane %v374_v60, %v1343_v16 }
  0x48   :  { %v416_v2 = vmul.f32 %v379_v50, %v1346_v20  ;;  %v417_v3 = vmul.f32 %v383_v0, %v1362_v31  ;;  %v418_v4 = vmul.f32 %v387_v51, %v1358_v30  ;;  %v419_v11 = vmul.f32 %v391_v52, %v1388_v46  ;;  %v1796_v50 = vld [vmem:[#allocation18_spill] sm:$0xff] }
  0x49   :  { %v420_v12 = vmul.f32 %v395_v53, %v1349_v22  ;;  %v421_v13 = vmul.f32 %v399_v54, %v1369_v34  ;;  %v422_v18 = vmul.f32 %v403_v55, %v1365_v32  ;;  %v423_v19 = vmul.f32 %v407_v63, %v1392_v47 }
  0x4a   :  { %v432_v21 = vrot.slane %v1433_v62, %v1327_v5  ;;  %v436_v60 = vrot.slane %v1433_v62, %v1329_v6  ;;  %v440_v23 = vrot.slane %v1433_v62, %v1331_v7  ;;  %v444_v24 = vrot.slane %v1433_v62, %v1333_v8 }
  0x4b   :  { %v448_v27 = vrot.slane %v1433_v62, %v1335_v9  ;;  %v452_v29 = vrot.slane %v1433_v62, %v1339_v14  ;;  %v456_v33 = vrot.slane %v1433_v62, %v1341_v15  ;;  %v460_v35 = vrot.slane %v1433_v62, %v1343_v16 }
  0x4c   :  { %v469_v38 = vmul.f32 %v432_v21, %v1352_v26  ;;  %v470_v39 = vmul.f32 %v436_v60, %v1376_v37  ;;  %v471_v40 = vmul.f32 %v440_v23, %v1372_v36  ;;  %v472_v10 = vmul.f32 %v444_v24, %v1794_v41  ;;  %v958_v41 = vld [vmem:[#allocation2 + $0x43] ss:$8 sm:$0xf] }
  0x4d   :  { %v473_v42 = vmul.f32 %v448_v27, %v1795_v28  ;;  %v474_v43 = vmul.f32 %v452_v29, %v1419_v17  ;;  %v475_v0 = vmul.f32 %v456_v33, %v1796_v50  ;;  %v476_v51 = vmul.f32 %v460_v35, %v1426_v25  ;;  %v959_v36 = vld [vmem:[#allocation2 + $0x43] ss:$8 sm:$0xf0] }
  0x4e   :  { %v477_v52 = vadd.f32 %v469_v38, %v416_v2  ;;  %v478_v53 = vadd.f32 %v470_v39, %v417_v3  ;;  %v479_v54 = vadd.f32 %v471_v40, %v418_v4  ;;  %v480_v62 = vadd.f32 %v472_v10, %v419_v11 }
  0x4f   :  { %v481_v55 = vadd.f32 %v473_v42, %v420_v12  ;;  %v482_v63 = vadd.f32 %v474_v43, %v421_v13  ;;  %v483_v21 = vadd.f32 %v475_v0, %v422_v18  ;;  %v484_v60 = vadd.f32 %v476_v51, %v423_v19 }
  0x50   :  { %v493_v23 = vrot.slane %v1435_v1, %v1327_v5  ;;  %v497_v24 = vrot.slane %v1435_v1, %v1329_v6  ;;  %v501_v27 = vrot.slane %v1435_v1, %v1331_v7  ;;  %v505_v29 = vrot.slane %v1435_v1, %v1333_v8 }
  0x51   :  { %v509_v2 = vrot.slane %v1435_v1, %v1335_v9  ;;  %v513_v3 = vrot.slane %v1435_v1, %v1339_v14  ;;  %v517_v4 = vrot.slane %v1435_v1, %v1341_v15  ;;  %v521_v11 = vrot.slane %v1435_v1, %v1343_v16 }
  0x52   :  { %v530_v12 = vadd.f32 %v493_v23, %v477_v52  ;;  %v531_v13 = vadd.f32 %v497_v24, %v478_v53  ;;  %v532_v18 = vadd.f32 %v501_v27, %v479_v54  ;;  %v533_v19 = vadd.f32 %v505_v29, %v480_v62  ;;  %v661_v23 = vld [vmem:[#allocation2 + $0x6] ss:$8 sm:$0xf]  ;;  %v722_v27 = vld [vmem:[#allocation2 + $0x42] ss:$8 sm:$0xf] }
  0x53   :  { %v534_v33 = vadd.f32 %v509_v2, %v481_v55  ;;  %v535_v35 = vadd.f32 %v513_v3, %v482_v63  ;;  %v536_v38 = vadd.f32 %v517_v4, %v483_v21  ;;  %v537_v39 = vadd.f32 %v521_v11, %v484_v60  ;;  %v608_v21 = vld [vmem:[#allocation2 + $0x2] ss:$8 sm:$0xf]  ;;  %v662_v24 = vld [vmem:[#allocation2 + $0x6] ss:$8 sm:$0xf0] }
  0x54   :  { %v538_v40 = vmax.f32 %v530_v12, 0.0  ;;  %v539_v10 = vmax.f32 %v531_v13, 0.0  ;;  %v540_v42 = vmax.f32 %v532_v18, 0.0  ;;  %v541_v43 = vmax.f32 %v533_v19, 0.0 }
  0x55   :  { %v542_v0 = vmax.f32 %v534_v33, 0.0  ;;  %v543_v51 = vmax.f32 %v535_v35, 0.0  ;;  %v544_v25 = vmax.f32 %v536_v38, 0.0  ;;  %v545_v50 = vmax.f32 %v537_v39, 0.0 }
  0x56   :  { %v554_v17 = vrot.slane %v1437_v61, %v1327_v5  ;;  %v558_v1 = vrot.slane %v1437_v61, %v1329_v6  ;;  %v562_v52 = vrot.slane %v1437_v61, %v1331_v7  ;;  %v566_v53 = vrot.slane %v1437_v61, %v1333_v8  ;;  %v609_v60 = vld [vmem:[#allocation2 + $0x2] ss:$8 sm:$0xf0]  ;;  %v783_v2 = vld [vmem:[#allocation2 + $0x46] ss:$8 sm:$0xf] }
  0x57   :  { %v570_v54 = vrot.slane %v1437_v61, %v1335_v9  ;;  %v574_v62 = vrot.slane %v1437_v61, %v1339_v14  ;;  %v578_v55 = vrot.slane %v1437_v61, %v1341_v15  ;;  %v582_v63 = vrot.slane %v1437_v61, %v1343_v16  ;;  %v723_v29 = vld [vmem:[#allocation2 + $0x42] ss:$8 sm:$0xf0]  ;;  %v784_v3 = vld [vmem:[#allocation2 + $0x46] ss:$8 sm:$0xf0] }
  0x58   :  { %v591_v4 = vmul.f32 %v554_v17, %v538_v40  ;;  %v592_v11 = vmul.f32 %v558_v1, %v539_v10  ;;  %v593_v12 = vmul.f32 %v562_v52, %v540_v42  ;;  %v594_v13 = vmul.f32 %v566_v53, %v541_v43  ;;  %v844_v18 = vld [vmem:[#allocation2 + $0x3] ss:$8 sm:$0xf]  ;;  %v897_v33 = vld [vmem:[#allocation2 + $0x7] ss:$8 sm:$0xf] }
  0x59   :  { %v845_v19 = vld [vmem:[#allocation2 + $0x3] ss:$8 sm:$0xf0]  ;;  %v898_v35 = vld [vmem:[#allocation2 + $0x7] ss:$8 sm:$0xf0]  ;;  %v595_v38 = vmul.f32 %v570_v54, %v542_v0  ;;  %v596_v39 = vmul.f32 %v574_v62, %v543_v51  ;;  %v597_v28 = vmul.f32 %v578_v55, %v544_v25  ;;  %v598_v61 = vmul.f32 %v582_v63, %v545_v50 }
  0x5a   :  { %v1544_v37 = vadd.f32 %v591_v4, %v1455_v44  ;;  %v1547_v26 = vadd.f32 %v592_v11, %v1457_v45  ;;  %v1550_v17 = vadd.f32 %v593_v12, %v1459_v56  ;;  %v1553_v40 = vadd.f32 %v594_v13, %v1461_v57  ;;  %v1019_v10 = vld [vmem:[#allocation2 + $0x47] ss:$8 sm:$0xf] }
  0x5b   :  { %v1020_v42 = vld [vmem:[#allocation2 + $0x47] ss:$8 sm:$0xf0]  ;;  %v1556_v43 = vadd.f32 %v595_v38, %v1463_v58  ;;  %v1559_v25 = vadd.f32 %v596_v39, %v1465_v59  ;;  %v1562_v44 = vadd.f32 %v597_v28, %v1467_v48  ;;  %v1565_v45 = vadd.f32 %v598_v61, %v1469_v49 }
  0x5c   :  { %v610_v50 = vor.u32 %v609_v60, %v608_v21  ;;  %v663_v56 = vor.u32 %v662_v24, %v661_v23  ;;  %v724_v0 = vor.u32 %v723_v29, %v722_v27  ;;  %v1567_v51 = vor.u32 %v784_v3, %v783_v2  ;;  %v1802_v39 = vld [vmem:[#allocation15_spill] sm:$0xff] }
  0x5d   :  { %v1569_v57 = vor.u32 %v845_v19, %v844_v18  ;;  %v1571_v1 = vor.u32 %v898_v35, %v897_v33  ;;  %v1573_v58 = vor.u32 %v959_v36, %v958_v41  ;;  %v1575_v52 = vor.u32 %v1020_v42, %v1019_v10  ;;  %v1800_v19 = vld [vmem:[#allocation13_spill] sm:$0xff]  ;;  %v1801_v35 = vld [vmem:[#allocation16_spill] sm:$0xff] }
  0x5e   :  { %v615_v59 = vrot.slane %v610_v50, %v1327_v5  ;;  %v619_v48 = vrot.slane %v610_v50, %v1329_v6  ;;  %v623_v49 = vrot.slane %v610_v50, %v1331_v7  ;;  %v627_v28 = vrot.slane %v610_v50, %v1333_v8  ;;  %v1803_v10 = vld [vmem:[#allocation17_spill] sm:$0xff] }
  0x5f   :  { %1797 = vst [vmem:[#allocation21_spill] sm:$0xff] %v1571_v1  ;;  %1798 = vst [vmem:[#allocation22_spill] sm:$0xff] %v1573_v58  ;;  %v631_v53 = vrot.slane %v610_v50, %v1335_v9  ;;  %v635_v54 = vrot.slane %v610_v50, %v1339_v14  ;;  %v639_v62 = vrot.slane %v610_v50, %v1341_v15 }
  0x60   :  { %1799 = vst [vmem:[#allocation23_spill] sm:$0xff] %v1575_v52  ;;  %v643_v55 = vrot.slane %v610_v50, %v1343_v16  ;;  %v652_v36 = vmul.f32 %v615_v59, %v1346_v20  ;;  %v653_v41 = vmul.f32 %v619_v48, %v1362_v31  ;;  %v654_v63 = vmul.f32 %v623_v49, %v1358_v30  ;;  %v1804_v50 = vld [vmem:[#allocation14_spill] sm:$0xff]  ;;  %v1805_v48 = vld [vmem:[#allocation19_spill] sm:$0xff] }
  0x61   :  { %v655_v21 = vmul.f32 %v627_v28, %v1388_v46  ;;  %v656_v60 = vmul.f32 %v631_v53, %v1349_v22  ;;  %v657_v23 = vmul.f32 %v635_v54, %v1369_v34  ;;  %v658_v24 = vmul.f32 %v639_v62, %v1365_v32  ;;  %v1806_v28 = vld [vmem:[#allocation18_spill] sm:$0xff]  ;;  %v1807_v54 = vld [vmem:[#allocation20_spill] sm:$0xff] }
  0x62   :  { %v659_v27 = vmul.f32 %v643_v55, %v1392_v47  ;;  %v668_v29 = vrot.slane %v663_v56, %v1327_v5  ;;  %v672_v2 = vrot.slane %v663_v56, %v1329_v6  ;;  %v676_v3 = vrot.slane %v663_v56, %v1331_v7 }
  0x63   :  { %v680_v4 = vrot.slane %v663_v56, %v1333_v8  ;;  %v684_v11 = vrot.slane %v663_v56, %v1335_v9  ;;  %v688_v12 = vrot.slane %v663_v56, %v1339_v14  ;;  %v692_v13 = vrot.slane %v663_v56, %v1341_v15 }
  0x64   :  { %v696_v18 = vrot.slane %v663_v56, %v1343_v16  ;;  %v705_v33 = vmul.f32 %v668_v29, %v1800_v19  ;;  %v706_v38 = vmul.f32 %v672_v2, %v1801_v35  ;;  %v707_v61 = vmul.f32 %v676_v3, %v1802_v39 }
  0x65   :  { %v708_v42 = vmul.f32 %v680_v4, %v1803_v10  ;;  %v709_v59 = vmul.f32 %v684_v11, %v1804_v50  ;;  %v710_v49 = vmul.f32 %v688_v12, %v1805_v48  ;;  %v711_v53 = vmul.f32 %v692_v13, %v1806_v28 }
  0x66   :  { %v712_v62 = vmul.f32 %v696_v18, %v1807_v54  ;;  %v713_v55 = vadd.f32 %v705_v33, %v652_v36  ;;  %v714_v52 = vadd.f32 %v706_v38, %v653_v41  ;;  %v715_v58 = vadd.f32 %v707_v61, %v654_v63 }
  0x67   :  { %v716_v56 = vadd.f32 %v708_v42, %v655_v21  ;;  %v717_v1 = vadd.f32 %v709_v59, %v656_v60  ;;  %v718_v29 = vadd.f32 %v710_v49, %v657_v23  ;;  %v719_v19 = vadd.f32 %v711_v53, %v658_v24 }
  0x68   :  { %v720_v2 = vadd.f32 %v712_v62, %v659_v27  ;;  %v729_v3 = vrot.slane %v724_v0, %v1327_v5  ;;  %v733_v4 = vrot.slane %v724_v0, %v1329_v6  ;;  %v737_v11 = vrot.slane %v724_v0, %v1331_v7 }
  0x69   :  { %v741_v12 = vrot.slane %v724_v0, %v1333_v8  ;;  %v745_v13 = vrot.slane %v724_v0, %v1335_v9  ;;  %v749_v18 = vrot.slane %v724_v0, %v1339_v14  ;;  %v753_v36 = vrot.slane %v724_v0, %v1341_v15 }
  0x6a   :  { %v757_v41 = vrot.slane %v724_v0, %v1343_v16  ;;  %v766_v63 = vadd.f32 %v729_v3, %v713_v55  ;;  %v767_v21 = vadd.f32 %v733_v4, %v714_v52  ;;  %v768_v60 = vadd.f32 %v737_v11, %v715_v58 }
  0x6b   :  { %v769_v23 = vadd.f32 %v741_v12, %v716_v56  ;;  %v770_v24 = vadd.f32 %v745_v13, %v717_v1  ;;  %v771_v27 = vadd.f32 %v749_v18, %v718_v29  ;;  %v772_v33 = vadd.f32 %v753_v36, %v719_v19 }
  0x6c   :  { %v773_v38 = vadd.f32 %v757_v41, %v720_v2  ;;  %v774_v61 = vmax.f32 %v766_v63, 0.0  ;;  %v775_v42 = vmax.f32 %v767_v21, 0.0  ;;  %v776_v59 = vmax.f32 %v768_v60, 0.0 }
  0x6d   :  { %v777_v49 = vmax.f32 %v769_v23, 0.0  ;;  %v778_v53 = vmax.f32 %v770_v24, 0.0  ;;  %v779_v62 = vmax.f32 %v771_v27, 0.0  ;;  %v780_v54 = vmax.f32 %v772_v33, 0.0 }
  0x6e   :  { %v781_v28 = vmax.f32 %v773_v38, 0.0  ;;  %v790_v48 = vrot.slane %v1567_v51, %v1327_v5  ;;  %v794_v0 = vrot.slane %v1567_v51, %v1329_v6  ;;  %v798_v1 = vrot.slane %v1567_v51, %v1331_v7 }
  0x6f   :  { %v802_v58 = vrot.slane %v1567_v51, %v1333_v8  ;;  %v806_v52 = vrot.slane %v1567_v51, %v1335_v9  ;;  %v810_v19 = vrot.slane %v1567_v51, %v1339_v14  ;;  %v814_v55 = vrot.slane %v1567_v51, %v1341_v15 }
  0x70   :  { %v818_v56 = vrot.slane %v1567_v51, %v1343_v16  ;;  %v827_v29 = vmul.f32 %v790_v48, %v774_v61  ;;  %v828_v2 = vmul.f32 %v794_v0, %v775_v42  ;;  %v829_v3 = vmul.f32 %v798_v1, %v776_v59  ;;  %v1808_v59 = vld [vmem:[#allocation21_spill] sm:$0xff] }
  0x71   :  { %v830_v4 = vmul.f32 %v802_v58, %v777_v49  ;;  %v831_v11 = vmul.f32 %v806_v52, %v778_v53  ;;  %v832_v12 = vmul.f32 %v810_v19, %v779_v62  ;;  %v833_v13 = vmul.f32 %v814_v55, %v780_v54  ;;  %v1810_v58 = vld [vmem:[#allocation19_spill] sm:$0xff]  ;;  %v1811_v19 = vld [vmem:[#allocation18_spill] sm:$0xff] }
  0x72   :  { %v834_v18 = vmul.f32 %v818_v56, %v781_v28  ;;  %v1634_v36 = vadd.f32 %v827_v29, %v1544_v37  ;;  %v1637_v41 = vadd.f32 %v828_v2, %v1547_v26  ;;  %v1640_v63 = vadd.f32 %v829_v3, %v1550_v17  ;;  %v1812_v56 = vld [vmem:[#allocation20_spill] sm:$0xff] }
  0x73   :  { %v1643_v21 = vadd.f32 %v830_v4, %v1553_v40  ;;  %v1646_v51 = vadd.f32 %v831_v11, %v1556_v43  ;;  %v1649_v48 = vadd.f32 %v832_v12, %v1559_v25  ;;  %v1652_v28 = vadd.f32 %v833_v13, %v1562_v44 }
  0x74   :  { %v1655_v37 = vadd.f32 %v834_v18, %v1565_v45  ;;  %v851_v26 = vrot.slane %v1569_v57, %v1327_v5  ;;  %v855_v17 = vrot.slane %v1569_v57, %v1329_v6  ;;  %v859_v40 = vrot.slane %v1569_v57, %v1331_v7 }
  0x75   :  { %v863_v43 = vrot.slane %v1569_v57, %v1333_v8  ;;  %v867_v25 = vrot.slane %v1569_v57, %v1335_v9  ;;  %v871_v44 = vrot.slane %v1569_v57, %v1339_v14  ;;  %v875_v45 = vrot.slane %v1569_v57, %v1341_v15 }
  0x76   :  { %v879_v54 = vrot.slane %v1569_v57, %v1343_v16  ;;  %v888_v60 = vmul.f32 %v851_v26, %v1346_v20  ;;  %v889_v23 = vmul.f32 %v855_v17, %v1362_v31  ;;  %v890_v24 = vmul.f32 %v859_v40, %v1358_v30 }
  0x77   :  { %v891_v27 = vmul.f32 %v863_v43, %v1388_v46  ;;  %v892_v33 = vmul.f32 %v867_v25, %v1349_v22  ;;  %v893_v38 = vmul.f32 %v871_v44, %v1369_v34  ;;  %v894_v61 = vmul.f32 %v875_v45, %v1365_v32 }
  0x78   :  { %v895_v42 = vmul.f32 %v879_v54, %v1392_v47  ;;  %v904_v49 = vrot.slane %v1808_v59, %v1327_v5  ;;  %v908_v20 = vrot.slane %v1808_v59, %v1329_v6  ;;  %v912_v31 = vrot.slane %v1808_v59, %v1331_v7  ;;  %v1809_v47 = vld [vmem:[#allocation13_spill] sm:$0xff] }
  0x79   :  { %v916_v30 = vrot.slane %v1808_v59, %v1333_v8  ;;  %v920_v22 = vrot.slane %v1808_v59, %v1335_v9  ;;  %v924_v32 = vrot.slane %v1808_v59, %v1339_v14  ;;  %v928_v34 = vrot.slane %v1808_v59, %v1341_v15 }
  0x7a   :  { %v932_v46 = vrot.slane %v1808_v59, %v1343_v16  ;;  %v941_v57 = vmul.f32 %v904_v49, %v1809_v47  ;;  %v942_v53 = vmul.f32 %v908_v20, %v1801_v35  ;;  %v943_v62 = vmul.f32 %v912_v31, %v1802_v39  ;;  %v1813_v39 = vld [vmem:[#allocation22_spill] sm:$0xff] }
  0x7b   :  { %v944_v0 = vmul.f32 %v916_v30, %v1803_v10  ;;  %v945_v1 = vmul.f32 %v920_v22, %v1804_v50  ;;  %v946_v52 = vmul.f32 %v924_v32, %v1810_v58  ;;  %v947_v55 = vmul.f32 %v928_v34, %v1811_v19  ;;  %v1814_v32 = vld [vmem:[#allocation23_spill] sm:$0xff] }
  0x7c   :  { %v948_v29 = vmul.f32 %v932_v46, %v1812_v56  ;;  %v949_v2 = vadd.f32 %v941_v57, %v888_v60  ;;  %v950_v3 = vadd.f32 %v942_v53, %v889_v23  ;;  %v951_v4 = vadd.f32 %v943_v62, %v890_v24 }
  0x7d   :  { %v952_v11 = vadd.f32 %v944_v0, %v891_v27  ;;  %v953_v12 = vadd.f32 %v945_v1, %v892_v33  ;;  %v954_v13 = vadd.f32 %v946_v52, %v893_v38  ;;  %v955_v18 = vadd.f32 %v947_v55, %v894_v61 }
  0x7e   :  { %v956_v35 = vadd.f32 %v948_v29, %v895_v42  ;;  %v965_v26 = vrot.slane %v1813_v39, %v1327_v5  ;;  %v969_v10 = vrot.slane %v1813_v39, %v1329_v6  ;;  %v973_v50 = vrot.slane %v1813_v39, %v1331_v7 }
  0x7f   :  { %v977_v17 = vrot.slane %v1813_v39, %v1333_v8  ;;  %v981_v40 = vrot.slane %v1813_v39, %v1335_v9  ;;  %v985_v43 = vrot.slane %v1813_v39, %v1339_v14  ;;  %v989_v25 = vrot.slane %v1813_v39, %v1341_v15 }
  0x80   :  { %v993_v44 = vrot.slane %v1813_v39, %v1343_v16  ;;  %v1002_v45 = vadd.f32 %v965_v26, %v949_v2  ;;  %v1003_v54 = vadd.f32 %v969_v10, %v950_v3  ;;  %v1004_v60 = vadd.f32 %v973_v50, %v951_v4  ;;  %v1080_v4 = vld [vmem:[#allocation2 + $0x80] ss:$8 sm:$0xf] }
  0x81   :  { %v1005_v23 = vadd.f32 %v977_v17, %v952_v11  ;;  %v1006_v24 = vadd.f32 %v981_v40, %v953_v12  ;;  %v1007_v27 = vadd.f32 %v985_v43, %v954_v13  ;;  %v1008_v33 = vadd.f32 %v989_v25, %v955_v18  ;;  %v1081_v11 = vld [vmem:[#allocation2 + $0x80] ss:$8 sm:$0xf0] }
  0x82   :  { %v1009_v38 = vadd.f32 %v993_v44, %v956_v35  ;;  %v1010_v61 = vmax.f32 %v1002_v45, 0.0  ;;  %v1011_v42 = vmax.f32 %v1003_v54, 0.0  ;;  %v1012_v59 = vmax.f32 %v1004_v60, 0.0 }
  0x83   :  { %v1013_v49 = vmax.f32 %v1005_v23, 0.0  ;;  %v1014_v20 = vmax.f32 %v1006_v24, 0.0  ;;  %v1015_v31 = vmax.f32 %v1007_v27, 0.0  ;;  %v1016_v30 = vmax.f32 %v1008_v33, 0.0  ;;  %v1815_v24 = vld [vmem:[#allocation12_spill] sm:$0xff] }
  0x84   :  { %v1017_v22 = vmax.f32 %v1009_v38, 0.0  ;;  %v1026_v34 = vrot.slane %v1814_v32, %v1327_v5  ;;  %v1030_v46 = vrot.slane %v1814_v32, %v1329_v6  ;;  %v1034_v47 = vrot.slane %v1814_v32, %v1331_v7 }
  0x85   :  { %v1038_v57 = vrot.slane %v1814_v32, %v1333_v8  ;;  %v1042_v53 = vrot.slane %v1814_v32, %v1335_v9  ;;  %v1046_v62 = vrot.slane %v1814_v32, %v1339_v14  ;;  %v1050_v0 = vrot.slane %v1814_v32, %v1341_v15 }
  0x86   :  { %v1054_v1 = vrot.slane %v1814_v32, %v1343_v16  ;;  %v1063_v58 = vmul.f32 %v1026_v34, %v1010_v61  ;;  %v1064_v52 = vmul.f32 %v1030_v46, %v1011_v42  ;;  %v1065_v19 = vmul.f32 %v1034_v47, %v1012_v59 }
  0x87   :  { %v1066_v55 = vmul.f32 %v1038_v57, %v1013_v49  ;;  %v1067_v56 = vmul.f32 %v1042_v53, %v1014_v20  ;;  %v1068_v29 = vmul.f32 %v1046_v62, %v1015_v31  ;;  %v1069_v2 = vmul.f32 %v1050_v0, %v1016_v30 }
  0x88   :  { %v1070_v3 = vmul.f32 %v1054_v1, %v1017_v22  ;;  %v1071_v12 = vadd.f32 %v1063_v58, %v1634_v36  ;;  %v1072_v13 = vadd.f32 %v1064_v52, %v1637_v41  ;;  %v1073_v18 = vadd.f32 %v1065_v19, %v1640_v63 }
  0x89   :  { %v1074_v35 = vadd.f32 %v1066_v55, %v1643_v21  ;;  %v1082_v39 = vor.u32 %v1081_v11, %v1080_v4  ;;  %v1075_v26 = vadd.f32 %v1067_v56, %v1646_v51  ;;  %v1076_v10 = vadd.f32 %v1068_v29, %v1649_v48 }
  0x8a   :  { %v1077_v50 = vadd.f32 %v1069_v2, %v1652_v28  ;;  %v1078_v17 = vadd.f32 %v1070_v3, %v1655_v37 }
  0x8b   :  { %v1087_v40 = vrot.slane %v1082_v39, %v1327_v5  ;;  %v1091_v43 = vrot.slane %v1082_v39, %v1329_v6  ;;  %v1095_v36 = vrot.slane %v1082_v39, %v1331_v7  ;;  %v1099_v41 = vrot.slane %v1082_v39, %v1333_v8 }
  0x8c   :  { %v1103_v63 = vrot.slane %v1082_v39, %v1335_v9  ;;  %v1107_v21 = vrot.slane %v1082_v39, %v1339_v14  ;;  %v1111_v51 = vrot.slane %v1082_v39, %v1341_v15  ;;  %v1115_v48 = vrot.slane %v1082_v39, %v1343_v16 }
  0x8d   :  { %v1124_v25 = vadd.f32 %v1087_v40, %v1071_v12  ;;  %v1125_v28 = vadd.f32 %v1091_v43, %v1072_v13  ;;  %v1126_v44 = vadd.f32 %v1095_v36, %v1073_v18  ;;  %v1127_v37 = vadd.f32 %v1099_v41, %v1074_v35 }
  0x8e   :  { %v1128_v45 = vadd.f32 %v1103_v63, %v1075_v26  ;;  %v1129_v5 = vadd.f32 %v1107_v21, %v1076_v10  ;;  %v1130_v54 = vadd.f32 %v1111_v51, %v1077_v50  ;;  %v1131_v6 = vadd.f32 %v1115_v48, %v1078_v17 }
  0x8f   :  { %v1140_v60 = vcombine.low %v1124_v25, %v1125_v28  ;;  %v1141_v7 = vcombine.low %v1126_v44, %v1127_v37 }
  0x90   :  { %v1157_v23 = vcombine.low %v1128_v45, %v1129_v5  ;;  %v1158_v8 = vcombine.low %v1130_v54, %v1131_v6 }
  0x91   :  { %v1148_v9 = vrot.slane %v1140_v60, %v1815_v24  ;;  %v1155_v14 = vrot.slane %v1141_v7, %v1815_v24 }
  0x92   :  { %v1165_v15 = vrot.slane %v1157_v23, %v1815_v24  ;;  %v1172_v16 = vrot.slane %v1158_v8, %v1815_v24 }
  0x93   :  { %v1156_v27 = vcombine.low %v1148_v9, %v1155_v14 }
  0x94   :  { %v1173_v33 = vcombine.low %v1165_v15, %v1172_v16 }
  0x95   :  { %1176 = vst [vmem:[#allocation8] sm:$0xff] %v1156_v27 }
  0x96   :  { %1177 = vst [vmem:[#allocation8 + $0x8] sm:$0xff] %v1173_v33 }
  0x97   :  { %1276 = shalt.err (!%p1273_p5)
}
  0x98   :  { %1187 = dma.vmem_to_hbm [thread:$0]  %s1185_s2, 256, %s1763_s3, [#allocation4]  }
  0x99   :  { %1289 = dma.done.wait [#allocation4], 256  }
  0x9a   :  { %1290 = vsyncadd [#allocation4], 4294967040 }
  0x9b   :  { %1191 = vsyncpa [#allocation3], 1 }
  0x9c   :  { %1192 = vsyncpa [#allocation6], 1 }
  0x9d   :  { %1193 = vsyncpa [#allocation4], 1 }

</bundles_post_ra>
